<compile_context>
chip_gen: v6e
topology: v6e:2x2x1
jax: 0.10.0
libtpu: 0.0.40
codegen_flags: <defaults>
</compile_context>

<pallas_src>
import functools

import jax
import jax.numpy as jnp
from jax import lax
from jax.experimental import pallas as pl
from jax.experimental.pallas import tpu as pltpu


GAMMA = 2.0
LABEL_SMOOTHING = 0.1


def _round_up(x, m):
    return ((x + m - 1) // m) * m


def _focal_loss_kernel(logits_ref, targets_ref, alpha_ref, out_ref, *,
                       n_valid, row_tile, label_smoothing, gamma):
    tile = pl.program_id(0)

    logits = logits_ref[...].astype(jnp.float32)   # (TM, C)
    targets = targets_ref[...]                     # (TM, 1) int32
    alpha = alpha_ref[...].astype(jnp.float32)     # (1, C)

    tm, c = logits.shape
    ls = jnp.float32(label_smoothing)

    # --- log-sum-exp along the class (lane) axis ---
    m = jnp.max(logits, axis=-1, keepdims=True)                        # (TM, 1)
    shifted = logits - m                                               # (TM, C)
    lse = jnp.log(jnp.sum(jnp.exp(shifted), axis=-1, keepdims=True))   # (TM, 1)

    # --- one-hot of integer targets via iota (no gather needed) ---
    class_ids = lax.broadcasted_iota(jnp.int32, (tm, c), 1)            # (TM, C)
    one_hot = (class_ids == targets).astype(jnp.float32)               # (TM, C)

    # --- label-smoothed cross entropy with a single fused lane reduction ---
    #   q  = one_hot*(1-ls) + ls/C,  sum(q) == 1
    #   ce = -sum(q * (shifted - lse)) = lse - sum(q * shifted)
    w = one_hot * (1.0 - ls) + (ls / jnp.float32(c))                   # (TM, C)
    ce = lse - jnp.sum(w * shifted, axis=-1, keepdims=True)            # (TM, 1)

    # --- focal term (gamma is static; 2.0 -> explicit square, no EUP pow) ---
    pt = jnp.exp(-ce)
    one_m_pt = 1.0 - pt
    g = float(gamma)
    if g == 2.0:
        focal = one_m_pt * one_m_pt
    elif g == int(g) and g >= 0.0:
        focal = lax.integer_pow(one_m_pt, int(g))
    else:
        focal = jnp.power(one_m_pt, jnp.float32(g))
    f_loss = focal * ce                                                # (TM, 1)

    # --- alpha_t = alpha[targets] via one-hot reduce on lanes ---
    alpha_t = jnp.sum(one_hot * alpha, axis=-1, keepdims=True)         # (TM, 1)
    f_loss = alpha_t * f_loss

    # --- mask ragged rows (jnp.where: garbage NaN/Inf cannot leak through) ---
    row_ids = tile * row_tile + lax.broadcasted_iota(jnp.int32, (tm, 1), 0)
    valid = row_ids < n_valid
    out_ref[0, 0] = jnp.sum(jnp.where(valid, f_loss, jnp.float32(0.0)))


def focal_loss(logits, targets, alpha_vec=None, *,
               gamma=GAMMA, label_smoothing=LABEL_SMOOTHING,
               reduction="mean", row_tile=None,
               vmem_budget_bytes=8 * 1024 * 1024):
    """logits: (N, C) float (f32 or bf16, fed in native dtype);
    targets: (N,) int; alpha_vec: (C,) float or None.
    Returns mean (default) or sum of the focal loss."""
    n, c = logits.shape
    if not jnp.issubdtype(logits.dtype, jnp.floating):
        logits = logits.astype(jnp.float32)
    itemsize = jnp.dtype(logits.dtype).itemsize
    # sublane multiple for the row axis: 8 (f32) / 16 (bf16) / 32 (int8)
    mult = max(8, 32 // itemsize)

    # VMEM bytes per row inside one pipeline buffer:
    #   lane-padded logits row + lane-padded (TM,1) int32 targets row
    padded_c = _round_up(max(c, 1), 128)
    vmem_row_bytes = padded_c * itemsize + 128 * 4

    if row_tile is None:
        rt = max(mult, vmem_budget_bytes // vmem_row_bytes)
        # keep >= ~4 grid steps so v7x can shard the parallel row axis over
        # its two TensorCores (no-op on v5e/v6e)
        rt = min(rt, _round_up(pl.cdiv(n, 4), mult))
    else:
        rt = int(row_tile)
    rt = max(mult, (rt // mult) * mult)
    rt = min(rt, _round_up(n, mult))
    row_tile = int(max(mult, rt))

    num_tiles = int(pl.cdiv(n, row_tile))

    targets_2d = targets.astype(jnp.int32).reshape(n, 1)
    if alpha_vec is None:
        alpha2d = jnp.ones((1, c), dtype=jnp.float32)
    else:
        alpha2d = alpha_vec.astype(jnp.float32).reshape(1, c)

    kernel = functools.partial(
        _focal_loss_kernel,
        n_valid=n, row_tile=row_tile,
        label_smoothing=float(label_smoothing), gamma=float(gamma))

    partials = pl.pallas_call(
        kernel,
        out_shape=jax.ShapeDtypeStruct((num_tiles, 1), jnp.float32),
        grid_spec=pltpu.PrefetchScalarGridSpec(
            num_scalar_prefetch=0,
            grid=(num_tiles,),
            in_specs=[
                pl.BlockSpec((row_tile, c), lambda i: (i, 0)),   # logits tile
                pl.BlockSpec((row_tile, 1), lambda i: (i, 0)),   # targets tile
                pl.BlockSpec((1, c), lambda i: (0, 0)),          # alpha (invariant)
            ],
            # Per-tile partial sums as SMEM scalars: no masked lane-1 VMEM
            # stores, independent blocks keep the row axis parallel.
            out_specs=pl.BlockSpec((1, 1), lambda i: (i, 0),
                                   memory_space=pltpu.MemorySpace.SMEM),
        ),
        compiler_params=pltpu.CompilerParams(
            dimension_semantics=("parallel",),
            vmem_limit_bytes=32 * 1024 * 1024),
    )(logits, targets_2d, alpha2d)

    total = jnp.sum(partials)
    if reduction == "mean":
        return total / jnp.float32(n)
    elif reduction == "sum":
        return total
    else:
        # TODO(synk): reduction='none' (per-element output) not implemented.
        raise NotImplementedError("reduction must be 'mean' or 'sum'")


def focal_loss_ref(logits, targets, alpha_vec=None, *,
                   gamma=GAMMA, label_smoothing=LABEL_SMOOTHING):
    """Pure-JAX reference mirroring the PyTorch module (reduction='mean')."""
    n, c = logits.shape
    log_probs = jax.nn.log_softmax(logits.astype(jnp.float32), axis=-1)
    one_hot = jax.nn.one_hot(targets, c, dtype=jnp.float32)
    q = one_hot * (1.0 - label_smoothing) + label_smoothing / c
    ce = -jnp.sum(q * log_probs, axis=-1)
    pt = jnp.exp(-ce)
    f_loss = (1.0 - pt) ** gamma * ce
    if alpha_vec is not None:
        f_loss = alpha_vec[targets] * f_loss
    return jnp.mean(f_loss)


if __name__ == "__main__":
    key = jax.random.PRNGKey(0)
    k1, k2, k3, k4, k5, k6 = jax.random.split(key, 6)

    # Small shapes consistent with the module's forward: batch of 8, 32 classes.
    N, C = 8, 32
    logits = jax.random.normal(k1, (N, C), dtype=jnp.float32)
    targets = jax.random.randint(k2, (N,), 0, C, dtype=jnp.int32)
    alpha_vec = 0.25 + 0.5 * (jnp.arange(C, dtype=jnp.float32) / C)

    loss = focal_loss(logits, targets, alpha_vec)
    jax.block_until_ready(loss)
    ref = focal_loss_ref(logits, targets, alpha_vec)
    assert jnp.allclose(loss, ref, rtol=1e-5, atol=1e-6), (loss, ref)

    # Multi-tile path with a ragged last block (no wrapper padding of logits).
    N2 = 20
    logits2 = jax.random.normal(k3, (N2, C), dtype=jnp.float32)
    targets2 = jax.random.randint(k4, (N2,), 0, C, dtype=jnp.int32)
    loss2 = focal_loss(logits2, targets2, alpha_vec, row_tile=8)
    jax.block_until_ready(loss2)
    ref2 = focal_loss_ref(logits2, targets2, alpha_vec)
    assert jnp.allclose(loss2, ref2, rtol=1e-5, atol=1e-6), (loss2, ref2)

    # bf16 logits fed in their native dtype (halved HBM read bytes).
    N3 = 64
    logits3 = jax.random.normal(k5, (N3, C), dtype=jnp.float32).astype(jnp.bfloat16)
    targets3 = jax.random.randint(k6, (N3,), 0, C, dtype=jnp.int32)
    loss3 = focal_loss(logits3, targets3, alpha_vec)
    jax.block_until_ready(loss3)
    ref3 = focal_loss_ref(logits3.astype(jnp.float32), targets3, alpha_vec)
    assert jnp.allclose(loss3, ref3, rtol=1e-4, atol=1e-5), (loss3, ref3)

    print("KERNEL_OK")
</pallas_src>

<mosaic_0001>
module attributes {stable_mosaic.version = 11 : i64} {
  func.func @_focal_loss_kernel(%arg0: i32, %arg1: memref<8x32xf32, #tpu.memory_space<vmem>>, %arg2: memref<8x1xi32, #tpu.memory_space<vmem>>, %arg3: memref<1x32xf32, #tpu.memory_space<vmem>>, %arg4: memref<1x1xf32, #tpu.memory_space<smem>>) attributes {dimension_semantics = [#tpu.dimension_semantics<parallel>], iteration_bounds = array<i64: 1>, scalar_prefetch = 0 : i64, scratch_operands = 0 : i64, tpu.core_type = #tpu.core_type<tc>, window_params = [{transform_indices = @transform_0, window_bounds = array<i64: 8, 32>}, {transform_indices = @transform_1, window_bounds = array<i64: 8, 1>}, {pipeline_mode = #tpu.pipeline_mode<synchronous>, transform_indices = @transform_2, window_bounds = array<i64: 1, 32>}, {transform_indices = @transform_3, window_bounds = array<i64: 1, 1>}]} {
    %c0 = arith.constant 0 : index
    %c0_0 = arith.constant 0 : index
    %0 = vector.load %arg1[%c0, %c0_0] : memref<8x32xf32, #tpu.memory_space<vmem>>, vector<8x32xf32>
    %c0_1 = arith.constant 0 : index
    %c0_2 = arith.constant 0 : index
    %1 = vector.load %arg2[%c0_1, %c0_2] : memref<8x1xi32, #tpu.memory_space<vmem>>, vector<8x1xi32>
    %c0_3 = arith.constant 0 : index
    %c0_4 = arith.constant 0 : index
    %2 = vector.load %arg3[%c0_3, %c0_4] : memref<1x32xf32, #tpu.memory_space<vmem>>, vector<1x32xf32>
    %cst = arith.constant dense<0xFF800000> : vector<8xf32>
    %3 = vector.multi_reduction <maximumf>, %0, %cst [1] : vector<8x32xf32> to vector<8xf32>
    %4 = vector.shape_cast %3 : vector<8xf32> to vector<8x1xf32>
    %5 = vector.broadcast %4 : vector<8x1xf32> to vector<8x32xf32>
    %6 = arith.subf %0, %5 : vector<8x32xf32>
    %7 = math.exp %6 : vector<8x32xf32>
    %cst_5 = arith.constant dense<0.000000e+00> : vector<8xf32>
    %8 = vector.multi_reduction <add>, %7, %cst_5 [1] : vector<8x32xf32> to vector<8xf32>
    %9 = vector.shape_cast %8 : vector<8xf32> to vector<8x1xf32>
    %10 = math.log %9 : vector<8x1xf32>
    %11 = tpu.iota {dimensions = array<i32: 1>} : vector<8x32xi32>
    %12 = vector.broadcast %1 : vector<8x1xi32> to vector<8x32xi32>
    %13 = arith.cmpi eq, %11, %12 : vector<8x32xi32>
    %14 = arith.extui %13 : vector<8x32xi1> to vector<8x32xi32>
    %15 = arith.sitofp %14 : vector<8x32xi32> to vector<8x32xf32>
    %cst_6 = arith.constant 1.000000e+00 : f32
    %cst_7 = arith.constant 1.000000e-01 : f32
    %16 = arith.subf %cst_6, %cst_7 : f32
    %17 = vector.broadcast %16 : f32 to vector<8x32xf32>
    %18 = arith.mulf %15, %17 : vector<8x32xf32>
    %cst_8 = arith.constant 1.000000e-01 : f32
    %cst_9 = arith.constant 3.200000e+01 : f32
    %19 = arith.divf %cst_8, %cst_9 : f32
    %20 = vector.broadcast %19 : f32 to vector<8x32xf32>
    %21 = arith.addf %18, %20 : vector<8x32xf32>
    %22 = arith.mulf %21, %6 : vector<8x32xf32>
    %cst_10 = arith.constant dense<0.000000e+00> : vector<8xf32>
    %23 = vector.multi_reduction <add>, %22, %cst_10 [1] : vector<8x32xf32> to vector<8xf32>
    %24 = vector.shape_cast %23 : vector<8xf32> to vector<8x1xf32>
    %25 = arith.subf %10, %24 : vector<8x1xf32>
    %cst_11 = arith.constant 0.000000e+00 : f32
    %26 = vector.broadcast %cst_11 : f32 to vector<8x1xf32>
    %27 = arith.subf %26, %25 : vector<8x1xf32>
    %28 = math.exp %27 : vector<8x1xf32>
    %cst_12 = arith.constant 1.000000e+00 : f32
    %29 = vector.broadcast %cst_12 : f32 to vector<8x1xf32>
    %30 = arith.subf %29, %28 : vector<8x1xf32>
    %31 = arith.mulf %30, %30 : vector<8x1xf32>
    %32 = arith.mulf %31, %25 : vector<8x1xf32>
    %33 = vector.broadcast %2 : vector<1x32xf32> to vector<8x32xf32>
    %34 = arith.mulf %15, %33 : vector<8x32xf32>
    %cst_13 = arith.constant dense<0.000000e+00> : vector<8xf32>
    %35 = vector.multi_reduction <add>, %34, %cst_13 [1] : vector<8x32xf32> to vector<8xf32>
    %36 = vector.shape_cast %35 : vector<8xf32> to vector<8x1xf32>
    %37 = arith.mulf %36, %32 : vector<8x1xf32>
    %c8_i32 = arith.constant 8 : i32
    %38 = arith.muli %arg0, %c8_i32 : i32
    %39 = tpu.iota {dimensions = array<i32: 0>} : vector<8x1xi32>
    %40 = vector.broadcast %38 : i32 to vector<8x1xi32>
    %41 = arith.addi %40, %39 : vector<8x1xi32>
    %c8_i32_14 = arith.constant 8 : i32
    %42 = vector.broadcast %c8_i32_14 : i32 to vector<8x1xi32>
    %43 = arith.cmpi slt, %41, %42 : vector<8x1xi32>
    %cst_15 = arith.constant 0.000000e+00 : f32
    %44 = vector.broadcast %cst_15 : f32 to vector<8x1xf32>
    %45 = arith.select %43, %37, %44 : vector<8x1xi1>, vector<8x1xf32>
    %46 = vector.shape_cast %45 : vector<8x1xf32> to vector<1x8x1xf32>
    %cst_16 = arith.constant dense<0.000000e+00> : vector<1xf32>
    %47 = vector.multi_reduction <add>, %46, %cst_16 [1, 2] : vector<1x8x1xf32> to vector<1xf32>
    %48 = vector.shape_cast %47 : vector<1xf32> to vector<1x1x1xf32>
    %49 = vector.extract %48[0, 0, 0] : f32 from vector<1x1x1xf32>
    %c0_17 = arith.constant 0 : index
    %c0_18 = arith.constant 0 : index
    %50 = memref.load %arg4[%c0_17, %c0_18] : memref<1x1xf32, #tpu.memory_space<smem>>
    memref.store %49, %arg4[%c0_17, %c0_18] : memref<1x1xf32, #tpu.memory_space<smem>>
    return
  }
  func.func @transform_0(%arg0: i32) -> (i32, i32) {
    %c0_i32 = arith.constant 0 : i32
    %c0_i32_0 = arith.constant 0 : i32
    return %arg0, %c0_i32 : i32, i32
  }
  func.func @transform_1(%arg0: i32) -> (i32, i32) {
    %c0_i32 = arith.constant 0 : i32
    %c0_i32_0 = arith.constant 0 : i32
    return %arg0, %c0_i32 : i32, i32
  }
  func.func @transform_2(%arg0: i32) -> (i32, i32) {
    %c0_i32 = arith.constant 0 : i32
    %c0_i32_0 = arith.constant 0 : i32
    %c0_i32_1 = arith.constant 0 : i32
    return %c0_i32, %c0_i32_0 : i32, i32
  }
  func.func @transform_3(%arg0: i32) -> (i32, i32) {
    %c0_i32 = arith.constant 0 : i32
    %c0_i32_0 = arith.constant 0 : i32
    return %arg0, %c0_i32 : i32, i32
  }
}

</mosaic_0001>

<bundles_post_ra>
// kernel: tpu_custom_call.1
= control target key start
LH: loop header
LB: loop body
LE: loop exit
PB: predicated region body
PF: predicated region fallthrough
CT: control target
= control target key end

     0   :  { %vm18_vm0 = vcmask 261120   ;;  %s158_s0 = inlined_call_operand.vmem [shape: f32[8,32], index: 0, kind: input, shape index: {}]   ;;  %s159_s1 = inlined_call_operand.vmem [shape: s32[8,1], index: 1, kind: input, shape index: {}]   ;;  %s160_s2 = inlined_call_operand.vmem [shape: f32[1,32], index: 2, kind: input, shape index: {}]   ;;  %s161_s3 = inlined_call_operand.hbm [shape: f32[1,1], index: 3, kind: output, shape index: {}]  }
   0x1   :  { %v15_v0 = vld [vmem:[%s158_s0] sm:$0xff] }
   0x2   :  { %8 = vsyncpa [#allocation3], 0  ;;  %v19_v1 = vsel %vm18_vm0, %v15_v0, -inf  ;;  %v119_v2 = vmov 0   ;;  %v16_v3 = vld [vmem:[%s159_s1] sm:$0xff]  ;;  %v30_v6 = vlaneseq  ;;  %v120_v10 = vmov 0.0  }
   0x3   :  { %102 = vset.pattern.permute.xlu0 %v119_v2  ;;  %v96_v15 = vld [vmem:[%s160_s2] ss:$0 sm:$0xff]  ;;  %vm69_vm2 = vcmask 7168   ;;  %s121_s2 = smov [#allocation2]  }
   0x4   :  { %20 = vmax.xlane.f32.xlu0 %v19_v1  ;;  %v31_v8 = vand.u32 127, %v30_v6 }
  0x1a   :  { %33 = vperm.xlu0 %102, %v16_v3  }
  0x8d   :  { %v21_v4 = vpop.xlane.xlu0 %20 }
  0x8e   :  { %v22_v5 = vsub.f32 %v15_v0, %v21_v4 }
  0x90   :  { %v23_v7 = vmul.f32 1.442695, %v22_v5 }
  0x92   :  { %103 = vpow2.f32 %v23_v7 }
  0x95   :  { %v34_v9 = vpop.permute.xlu0 %33 }
  0x96   :  { %vm35_vm1 = vcmp.eq.s32.totalorder %v31_v8, %v34_v9 }
  0x97   :  { %v95_v11 = vsel %vm35_vm1, 1.0, %v120_v10 }
  0x98   :  { %v38_v12 = vmul.f32 0.9, %v95_v11  ;;  %v57_v18 = vmul.f32 %v96_v15, %v95_v11 }
  0x9a   :  { %v39_v13 = vadd.f32 0.003125, %v38_v12  ;;  %v58_v20 = vsel %vm18_vm0, %v57_v18, 0.0 }
  0x9c   :  { %v40_v17 = vmul.f32 %v39_v13, %v22_v5 }
  0x9e   :  { %v41_v19 = vsel %vm18_vm0, %v40_v17, 0.0 }
  0x9f   :  { %v104_v14 = vpop.eup %103 }
  0xa0   :  { %v25_v16 = vsel %vm18_vm0, %v104_v14, 0.0 }
  0xa1   :  { %26 = vadd.xlane.f32.xlu1 %v25_v16 }
  0xa5   :  { %42 = vadd.xlane.f32.xlu1 %v41_v19 }
  0xa9   :  { %59 = vadd.xlane.f32.xlu1 %v58_v20 }
 0x12a   :  { %v27_v21 = vpop.xlane.xlu1 %26 }
 0x12b   :  { %105 = vlog2.f32 %v27_v21 }
 0x12e   :  { %v43_v24 = vpop.xlane.xlu1 %42 }
 0x132   :  { %v60_v32 = vpop.xlane.xlu1 %59 }
 0x138   :  { %v106_v22 = vpop.eup %105 }
 0x139   :  { %v29_v23 = vmul.f32 0.6931472, %v106_v22 }
 0x13b   :  { %v44_v25 = vsub.f32 %v29_v23, %v43_v24 }
 0x13d   :  { %v45_v26 = vsub.f32 0.0, %v44_v25 }
 0x13f   :  { %v46_v27 = vmul.f32 1.442695, %v45_v26 }
 0x141   :  { %107 = vpow2.f32 %v46_v27 }
 0x14e   :  { %v108_v28 = vpop.eup %107 }
 0x14f   :  { %v48_v29 = vsub.f32 1.0, %v108_v28 }
 0x151   :  { %v49_v30 = vmul.f32 %v48_v29, %v48_v29 }
 0x153   :  { %v50_v31 = vmul.f32 %v49_v30, %v44_v25 }
 0x155   :  { %v61_v33 = vmul.f32 %v60_v32, %v50_v31 }
 0x157   :  { %v70_v34 = vsel %vm69_vm2, %v61_v33, 0.0 }
 0x158   :  { %71 = vadd.xlane.f32.xlu1 %v70_v34 }
 0x1e1   :  { %v72_v35 = vpop.xlane.xlu1 %71 }
 0x1e2   :  { %v73_v36 = vrot.slane %v72_v35, 4 }
 0x1e4   :  { %v74_v37 = vadd.f32 %v73_v36, %v72_v35 }
 0x1e6   :  { %v75_v38 = vrot.slane %v74_v37, 2 }
 0x1e8   :  { %v76_v39 = vadd.f32 %v75_v38, %v74_v37 }
 0x1ea   :  { %v77_v40 = vrot.slane %v76_v39, 1 }
 0x1ec   :  { %v78_v41 = vadd.f32 %v77_v40, %v76_v39 }
 0x1ee   :  { %97 = vpush %v78_v41 }
 0x21f   :  { %s98_s1 = spop %97 }
 0x220   :  { %81 = sst [smem:[#allocation2]] %s98_s1 }
 0x221   :  { %89 = dma.smem_to_hbm %s121_s2, 16, %s161_s3, [#allocation3]  }
 0x222   :  { %117 = dma.done.wait [#allocation3], 16  }
 0x223   :  { %118 = vsyncadd [#allocation3], 4294967280 }
 0x224   :  { %93 = sfence }
 0x225   :  { %94 = vsyncpa [#allocation3], 1 }

</bundles_post_ra>
